<compile_context>
chip_gen: v5e
topology: v5e:2x2
jax: 0.10.0
libtpu: 0.0.40
codegen_flags: <defaults>
</compile_context>

<pallas_src>
import functools

import jax
import jax.numpy as jnp
from jax.experimental import pallas as pl
from jax.experimental.pallas import tpu as pltpu

LANES = 128                       # vreg lane width (last dim)
_TARGET_TILE_BYTES = 2 << 20      # ~2 MiB/tile: 4x (double-buffered in+out) = 8 MiB
_MIN_SPLIT_TILE_BYTES = 256 << 10  # only split a single-tile input if each half >= 256 KiB


def _round_up(v, m):
    return ((v + m - 1) // m) * m


def _sublane_multiple(dtype):
    # Packed-sublane tile heights: f32 -> 8, bf16/f16 -> 16, int8/fp8 -> 32.
    itemsize = jnp.dtype(dtype).itemsize
    return {4: 8, 2: 16, 1: 32}.get(itemsize, 8)


def _make_scale_kernel(scale):
    # `scale` is a compile-time Python scalar: no VMEM traffic, weak-typed
    # multiply so the input dtype is preserved.
    def kernel(x_ref, o_ref):
        o_ref[...] = x_ref[...] * scale
    return kernel


def _pick_tile_rows(rows, itemsize, sub):
    """Biggest dtype-aligned tile under the VMEM budget; >=2 grid steps when worthwhile."""
    max_tile_rows = max(sub, ((_TARGET_TILE_BYTES // (LANES * itemsize)) // sub) * sub)
    if rows > max_tile_rows:
        return max_tile_rows
    # Whole array fits in one tile.  If it is big enough, split in two so the
    # "parallel" grid axis can land on both TensorCores (v7x); otherwise keep
    # a single full-extent block (legal for any row count).
    half = _round_up(pl.cdiv(rows, 2), sub)
    if half < rows and half * LANES * itemsize >= _MIN_SPLIT_TILE_BYTES:
        return half
    return rows


def scale_forward(x, scale):
    """Pallas implementation of Scale.forward: returns x * scale."""
    orig_shape = x.shape
    dtype = x.dtype
    itemsize = jnp.dtype(dtype).itemsize
    sub = _sublane_multiple(dtype)
    total = x.size

    if total == 0:
        return x

    rows = pl.cdiv(total, LANES)
    aligned = (total % LANES) == 0

    flat = jnp.ravel(x)
    if not aligned:
        # Rare ragged-lane case: pad the flat tail up to a whole lane row.
        # (Costs one extra pad/slice pass; the aligned fast path avoids it.)
        flat = jnp.pad(flat, (0, rows * LANES - total))
    x2d = flat.reshape(rows, LANES)

    tile_rows = _pick_tile_rows(rows, itemsize, sub)
    grid = (pl.cdiv(rows, tile_rows),)

    cost = pl.CostEstimate(
        flops=int(total),
        transcendentals=0,
        bytes_accessed=int(2 * rows * LANES * itemsize),
    )

    out2d = pl.pallas_call(
        _make_scale_kernel(scale),
        out_shape=jax.ShapeDtypeStruct((rows, LANES), dtype),
        grid=grid,
        in_specs=[pl.BlockSpec((tile_rows, LANES), lambda i: (i, 0))],
        out_specs=pl.BlockSpec((tile_rows, LANES), lambda i: (i, 0)),
        compiler_params=pltpu.CompilerParams(
            dimension_semantics=("parallel",),  # shard row tiles across TCs (v7x)
        ),
        cost_estimate=cost,
    )(x2d)

    if aligned:
        return out2d.reshape(orig_shape)
    return out2d.reshape(-1)[:total].reshape(orig_shape)


if __name__ == "__main__":
    key = jax.random.PRNGKey(0)
    scale = 0.5  # Scale(scale=0.5)

    # Primary test: the module's nominal small input.
    x = jax.random.normal(key, (2, 4, 16, 16), dtype=jnp.float32)
    fwd = jax.jit(functools.partial(scale_forward, scale=scale))
    y = fwd(x)
    jax.block_until_ready(y)
    assert y.shape == x.shape and y.dtype == x.dtype
    assert bool(jnp.allclose(y, x * scale, rtol=1e-6, atol=1e-6))

    # Aligned bf16 input (exercises dtype-aware sublane handling).
    xb = jax.random.normal(jax.random.PRNGKey(1), (2, 8, 128), dtype=jnp.bfloat16)
    yb = jax.jit(functools.partial(scale_forward, scale=scale))(xb)
    jax.block_until_ready(yb)
    assert yb.dtype == xb.dtype
    assert bool(jnp.allclose(yb.astype(jnp.float32),
                             (xb * scale).astype(jnp.float32),
                             rtol=1e-2, atol=1e-2))

    # Ragged (non-128-multiple) input exercises the pad/slice fallback path.
    xr = jax.random.normal(jax.random.PRNGKey(2), (3, 5, 7), dtype=jnp.float32)
    yr = jax.jit(functools.partial(scale_forward, scale=scale))(xr)
    jax.block_until_ready(yr)
    assert bool(jnp.allclose(yr, xr * scale, rtol=1e-6, atol=1e-6))

    print("KERNEL_OK")
</pallas_src>

<mosaic_0001>
module attributes {stable_mosaic.version = 11 : i64} {
  func.func @kernel(%arg0: i32, %arg1: memref<16x128xf32, #tpu.memory_space<vmem>>, %arg2: memref<16x128xf32, #tpu.memory_space<vmem>>) attributes {dimension_semantics = [#tpu.dimension_semantics<parallel>], iteration_bounds = array<i64: 1>, scalar_prefetch = 0 : i64, scratch_operands = 0 : i64, tpu.core_type = #tpu.core_type<tc>, window_params = [{transform_indices = @transform_0, window_bounds = array<i64: 16, 128>}, {transform_indices = @transform_1, window_bounds = array<i64: 16, 128>}]} {
    %c0 = arith.constant 0 : index
    %c0_0 = arith.constant 0 : index
    %0 = vector.load %arg1[%c0, %c0_0] : memref<16x128xf32, #tpu.memory_space<vmem>>, vector<16x128xf32>
    %cst = arith.constant 5.000000e-01 : f32
    %1 = vector.broadcast %cst : f32 to vector<16x128xf32>
    %2 = arith.mulf %0, %1 : vector<16x128xf32>
    %c0_1 = arith.constant 0 : index
    %c0_2 = arith.constant 0 : index
    %3 = vector.load %arg2[%c0_1, %c0_2] : memref<16x128xf32, #tpu.memory_space<vmem>>, vector<16x128xf32>
    tpu.vector_store %arg2[%c0_1, %c0_2], %2 {strides = array<i32>} : memref<16x128xf32, #tpu.memory_space<vmem>>, vector<16x128xf32>,
    return
  }
  func.func @transform_0(%arg0: i32) -> (i32, i32) {
    %c0_i32 = arith.constant 0 : i32
    %c0_i32_0 = arith.constant 0 : i32
    return %arg0, %c0_i32 : i32, i32
  }
  func.func @transform_1(%arg0: i32) -> (i32, i32) {
    %c0_i32 = arith.constant 0 : i32
    %c0_i32_0 = arith.constant 0 : i32
    return %arg0, %c0_i32 : i32, i32
  }
}

</mosaic_0001>

<bundles_post_ra>
// kernel: scale_forward.1
= control target key start
LH: loop header
LB: loop body
LE: loop exit
PB: predicated region body
PF: predicated region fallthrough
CT: control target
= control target key end

     0   :  { %s40_s0 = inlined_call_operand.vmem [shape: f32[16,128], index: 0, kind: input, shape index: {}]   ;;  %s41_s1 = inlined_call_operand.vmem [shape: f32[16,128], index: 1, kind: output, shape index: {}]  }
   0x1   :  { %v8_v0 = vld [vmem:[%s40_s0] sm:$0xff]  ;;  %v9_v1 = vld [vmem:[%s40_s0 + $0x8] sm:$0xff] }
   0x2   :  { %v10_v2 = vmul.f32 0.5, %v8_v0  ;;  %v11_v3 = vmul.f32 0.5, %v9_v1 }
   0x4   :  { %12 = vst [vmem:[%s41_s1] sm:$0xff] %v10_v2 }
   0x5   :  { %13 = vst [vmem:[%s41_s1 + $0x8] sm:$0xff] %v11_v3 }

</bundles_post_ra>
